<compile_context>
chip_gen: v7x
topology: tpu7x:2x2x1
jax: 0.10.0
libtpu: 0.0.40
codegen_flags: <defaults>
</compile_context>

<pallas_src>
import jax
import jax.numpy as jnp
from jax.experimental import pallas as pl
from jax.experimental.pallas import tpu as pltpu

EPS = 1e-5
_MiB = 1024 * 1024


def layernorm_kernel(x_ref, scale_ref, shift_ref, o_ref):
    # x_ref: (tile_rows, D); scale_ref / shift_ref: (1, D) already in f32.
    #
    # Two-pass *centered* variance (matches torch.var(unbiased=False) and
    # avoids the E[x^2] - mean^2 cancellation issue). The mean is accumulated
    # in f32 straight from the native-dtype tile, so for bf16 inputs only ONE
    # full-tile f32 working copy (the centered tile `xc`) is kept live.
    x = x_ref[...]
    inv_d = jnp.float32(1.0 / x.shape[-1])
    mean = jnp.sum(x, axis=-1, keepdims=True, dtype=jnp.float32) * inv_d
    xc = x.astype(jnp.float32) - mean                       # single f32 copy
    var = jnp.sum(xc * xc, axis=-1, keepdims=True) * inv_d  # unbiased=False
    norm = xc * jax.lax.rsqrt(var + jnp.float32(EPS))
    # scale/shift pre-cast to f32 in the wrapper -> no per-grid-step casts.
    o_ref[...] = (scale_ref[...] * norm + shift_ref[...]).astype(o_ref.dtype)


def _tpu_vmem_info():
    """Returns (physical VMEM bytes, query_succeeded). Conservative fallback."""
    try:
        info = pltpu.get_tpu_info()
        v = int(getattr(info, "vmem_capacity_bytes", 0))
        if v > 0:
            return v, True
    except Exception:
        pass
    # Assume the smallest VMEM of any supported generation (v7x: 64 MiB/TC) so
    # a failed query can never over-provision.
    return 64 * _MiB, False


def _round_up(n, m):
    return ((n + m - 1) // m) * m


def _pick_tile_rows(R, D, dtype, *, budget_bytes, input_buffers, target=1024):
    """Largest sublane-aligned row tile whose live pipelined buffers fit the
    generation-aware VMEM budget; also clamped so the grid has >= 2 steps
    (when alignment allows) so the 'parallel' axis can shard across v7x's two
    TensorCores."""
    itemsize = jnp.dtype(dtype).itemsize
    # sublane alignment: 8 for 32-bit, 16 for bf16/fp16, 32 for int8/fp8
    align = 8 if itemsize >= 4 else (16 if itemsize == 2 else 32)
    # live bytes per row: N-buffered input + double-buffered output (native
    # dtype) plus ~2 f32 working copies (centered tile + fused normalize/spill
    # headroom).
    bytes_per_row = D * (input_buffers * itemsize + 2 * itemsize + 2 * 4)
    tr = min(target, max(align, budget_bytes // bytes_per_row))
    tr = max(align, (tr // align) * align)
    # never larger than the (alignment-rounded) row count
    r_up = _round_up(R, align)
    tr = min(tr, r_up)
    # prefer >= 2 grid steps so v7x's two TCs both get work; on single-TC
    # chips the extra grid step costs ~0.35 us and 512+ row tiles are already
    # ~85% of HBM roofline, so this is essentially free there.
    half = _round_up(-(-R // 2), align)
    if half < r_up:
        tr = min(tr, half)
    return tr


def layer_norm(x, scale, shift, *, tile_rows=None):
    """LayerNorm over the last dim of x (any leading dims)."""
    orig_shape = x.shape
    D = orig_shape[-1]
    x2 = x.reshape(-1, D)
    R = x2.shape[0]

    # ---- generation-aware VMEM budgeting -------------------------------
    phys_vmem, detected = _tpu_vmem_info()
    is_v7x_class = detected and phys_vmem <= 80 * _MiB   # 64 MiB/TC chips
    if phys_vmem >= 128 * _MiB:
        # v5e/v6e: raise the 16/32 MiB default scoped limit; plenty of headroom.
        vmem_limit_bytes = 64 * _MiB
    else:
        # v7x-class: stay well under the 64 MiB physical ceiling.
        vmem_limit_bytes = min(44 * _MiB, max(phys_vmem - 20 * _MiB, 16 * _MiB))
    # ~30% headroom for scale/shift buffers, semaphores and compiler scratch.
    budget_bytes = int(vmem_limit_bytes * 0.70)

    # On v7x HBM is ~2.2x faster, so per-step DMA issue latency is relatively
    # more exposed for a pure streaming kernel -> triple-buffer the input there.
    input_buffers = 3 if is_v7x_class else 2

    if tile_rows is None:
        tile_rows = _pick_tile_rows(
            R, D, x.dtype, budget_bytes=budget_bytes, input_buffers=input_buffers
        )

    # No host-side padding/concatenate: Pallas clips the final partial block.
    # This is safe ONLY because every row's reduction is independent and OOB
    # writes of the over-read rows are masked; a future cross-row reduction
    # would break this assumption.
    grid_rows = pl.cdiv(R, tile_rows)

    # Pre-cast params to the compute dtype once (no per-grid-step VPU casts).
    scale2 = scale.reshape(1, D).astype(jnp.float32)
    shift2 = shift.reshape(1, D).astype(jnp.float32)

    # x input spec; request deeper pipelining only on v7x-class chips.
    def _x_index_map(i):
        return (i, 0)

    x_spec = pl.BlockSpec((tile_rows, D), _x_index_map)
    if input_buffers != 2:
        try:
            x_spec = pl.BlockSpec(
                (tile_rows, D), _x_index_map, pipeline_mode=pl.Buffered(input_buffers)
            )
        except TypeError:
            x_spec = pl.BlockSpec((tile_rows, D), _x_index_map)

    elem = jnp.dtype(x.dtype).itemsize
    cost = pl.CostEstimate(
        flops=8 * R * D,
        transcendentals=R,
        bytes_accessed=2 * R * D * elem + 2 * D * 4,
    )

    out = pl.pallas_call(
        layernorm_kernel,
        out_shape=jax.ShapeDtypeStruct((R, D), x.dtype),
        grid_spec=pltpu.PrefetchScalarGridSpec(
            num_scalar_prefetch=0,
            grid=(grid_rows,),
            in_specs=[
                x_spec,
                # constant block index -> fetched once, not re-DMA'd per step
                pl.BlockSpec((1, D), lambda i: (0, 0)),
                pl.BlockSpec((1, D), lambda i: (0, 0)),
            ],
            out_specs=pl.BlockSpec((tile_rows, D), lambda i: (i, 0)),
        ),
        compiler_params=pltpu.CompilerParams(
            # row-grid is embarrassingly parallel -> shards across v7x's 2 TCs,
            # no-op on single-TC v5e/v6e.
            dimension_semantics=("parallel",),
            vmem_limit_bytes=vmem_limit_bytes,
        ),
        cost_estimate=cost,
    )(x2, scale2, shift2)

    return out.reshape(orig_shape)


def reference_layer_norm(x, scale, shift):
    mean = jnp.mean(x, axis=-1, keepdims=True)
    var = jnp.mean((x - mean) ** 2, axis=-1, keepdims=True)
    norm = (x - mean) / jnp.sqrt(var + EPS)
    return scale * norm + shift


if __name__ == "__main__":
    key = jax.random.PRNGKey(0)
    B, S, D = 2, 4, 768  # matches `x = torch.rand(2, 4, 768)`
    x = jax.random.uniform(key, (B, S, D), dtype=jnp.float32)

    # Deterministic parameter init, same as nn.Parameter(torch.ones/zeros(emb_dim))
    scale = jnp.ones((D,), dtype=jnp.float32)
    shift = jnp.zeros((D,), dtype=jnp.float32)

    y = layer_norm(x, scale, shift)
    y = jax.block_until_ready(y)

    y_ref = reference_layer_norm(x, scale, shift)
    assert y.shape == x.shape and y.dtype == x.dtype
    assert jnp.allclose(y, y_ref, atol=1e-5, rtol=1e-5)

    print("KERNEL_OK")
</pallas_src>

<mosaic_0001>
module attributes {stable_mosaic.version = 11 : i64} {
  func.func @layernorm_kernel(%arg0: i32, %arg1: memref<8x768xf32, #tpu.memory_space<vmem>>, %arg2: memref<1x768xf32, #tpu.memory_space<vmem>>, %arg3: memref<1x768xf32, #tpu.memory_space<vmem>>, %arg4: memref<8x768xf32, #tpu.memory_space<vmem>>) attributes {dimension_semantics = [#tpu.dimension_semantics<parallel>], iteration_bounds = array<i64: 1>, scalar_prefetch = 0 : i64, scratch_operands = 0 : i64, tpu.core_type = #tpu.core_type<tc>, window_params = [{transform_indices = @transform_0, window_bounds = array<i64: 8, 768>}, {pipeline_mode = #tpu.pipeline_mode<synchronous>, transform_indices = @transform_1, window_bounds = array<i64: 1, 768>}, {pipeline_mode = #tpu.pipeline_mode<synchronous>, transform_indices = @transform_2, window_bounds = array<i64: 1, 768>}, {transform_indices = @transform_3, window_bounds = array<i64: 8, 768>}]} {
    %c0 = arith.constant 0 : index
    %c0_0 = arith.constant 0 : index
    %0 = vector.load %arg1[%c0, %c0_0] : memref<8x768xf32, #tpu.memory_space<vmem>>, vector<8x768xf32>
    %cst = arith.constant dense<0.000000e+00> : vector<8xf32>
    %1 = vector.multi_reduction <add>, %0, %cst [1] : vector<8x768xf32> to vector<8xf32>
    %2 = vector.shape_cast %1 : vector<8xf32> to vector<8x1xf32>
    %cst_1 = arith.constant 0.00130208337 : f32
    %3 = vector.broadcast %cst_1 : f32 to vector<8x1xf32>
    %4 = arith.mulf %2, %3 : vector<8x1xf32>
    %5 = vector.broadcast %4 : vector<8x1xf32> to vector<8x768xf32>
    %6 = arith.subf %0, %5 : vector<8x768xf32>
    %7 = arith.mulf %6, %6 : vector<8x768xf32>
    %cst_2 = arith.constant dense<0.000000e+00> : vector<8xf32>
    %8 = vector.multi_reduction <add>, %7, %cst_2 [1] : vector<8x768xf32> to vector<8xf32>
    %9 = vector.shape_cast %8 : vector<8xf32> to vector<8x1xf32>
    %cst_3 = arith.constant 0.00130208337 : f32
    %10 = vector.broadcast %cst_3 : f32 to vector<8x1xf32>
    %11 = arith.mulf %9, %10 : vector<8x1xf32>
    %cst_4 = arith.constant 9.99999974E-6 : f32
    %12 = vector.broadcast %cst_4 : f32 to vector<8x1xf32>
    %13 = arith.addf %11, %12 : vector<8x1xf32>
    %14 = math.rsqrt %13 : vector<8x1xf32>
    %15 = vector.broadcast %14 : vector<8x1xf32> to vector<8x768xf32>
    %16 = arith.mulf %6, %15 : vector<8x768xf32>
    %c0_5 = arith.constant 0 : index
    %c0_6 = arith.constant 0 : index
    %17 = vector.load %arg2[%c0_5, %c0_6] : memref<1x768xf32, #tpu.memory_space<vmem>>, vector<1x768xf32>
    %18 = vector.broadcast %17 : vector<1x768xf32> to vector<8x768xf32>
    %19 = arith.mulf %18, %16 : vector<8x768xf32>
    %c0_7 = arith.constant 0 : index
    %c0_8 = arith.constant 0 : index
    %20 = vector.load %arg3[%c0_7, %c0_8] : memref<1x768xf32, #tpu.memory_space<vmem>>, vector<1x768xf32>
    %21 = vector.broadcast %20 : vector<1x768xf32> to vector<8x768xf32>
    %22 = arith.addf %19, %21 : vector<8x768xf32>
    %c0_9 = arith.constant 0 : index
    %c0_10 = arith.constant 0 : index
    %23 = vector.load %arg4[%c0_9, %c0_10] : memref<8x768xf32, #tpu.memory_space<vmem>>, vector<8x768xf32>
    tpu.vector_store %arg4[%c0_9, %c0_10], %22 {strides = array<i32>} : memref<8x768xf32, #tpu.memory_space<vmem>>, vector<8x768xf32>,
    return
  }
  func.func @transform_0(%arg0: i32) -> (i32, i32) {
    %c0_i32 = arith.constant 0 : i32
    %c0_i32_0 = arith.constant 0 : i32
    return %arg0, %c0_i32 : i32, i32
  }
  func.func @transform_1(%arg0: i32) -> (i32, i32) {
    %c0_i32 = arith.constant 0 : i32
    %c0_i32_0 = arith.constant 0 : i32
    %c0_i32_1 = arith.constant 0 : i32
    return %c0_i32, %c0_i32_0 : i32, i32
  }
  func.func @transform_2(%arg0: i32) -> (i32, i32) {
    %c0_i32 = arith.constant 0 : i32
    %c0_i32_0 = arith.constant 0 : i32
    %c0_i32_1 = arith.constant 0 : i32
    return %c0_i32, %c0_i32_0 : i32, i32
  }
  func.func @transform_3(%arg0: i32) -> (i32, i32) {
    %c0_i32 = arith.constant 0 : i32
    %c0_i32_0 = arith.constant 0 : i32
    return %arg0, %c0_i32 : i32, i32
  }
}

</mosaic_0001>

<bundles_post_ra>
// kernel: tpu_custom_call.1
= control target key start
LH: loop header
LB: loop body
LE: loop exit
PB: predicated region body
PF: predicated region fallthrough
CT: control target
= control target key end

     0   :  { %8 = vsyncpa [#allocation3], 0  ;;  %s318_s0 = inlined_call_operand.hbm [shape: f32[8,768], index: 0, kind: input, shape index: {}]   ;;  %s319_s1 = inlined_call_operand.hbm [shape: f32[1,768], index: 1, kind: input, shape index: {}]   ;;  %s320_s2 = inlined_call_operand.vmem [shape: f32[1,768], index: 2, kind: input, shape index: {}]   ;;  %s321_s3 = inlined_call_operand.hbm [shape: f32[8,768], index: 3, kind: output, shape index: {}]  }
   0x1   :  { %9 = vsyncpa [#allocation6], 0 }
   0x2   :  { %10 = vsyncpa [#allocation4], 0  ;;  %s256_s12 = smov [#allocation2]   ;;  %s257_s14 = smov [#allocation5]  }
   0x3   :  { %s17_s13 = sshll.u32 %s256_s12, 4  ;;  %s27_s15 = sshll.u32 %s257_s14, 4  ;;  %s18_s13 = int_to_ptr.vmem [resolvable:$true] %s17_s13  ;;  %s28_s15 = int_to_ptr.vmem [resolvable:$true] %s27_s15 }
   0x4   :  { %s184_s18 = scalar_lea.hbm %s318_s0, 768 }
   0x5   :  { %p185_p0 = scmp.ne.s32.totalorder %s318_s0, %s184_s18  ;;  %p188_p1 = scmp.lt.u32.totalorder %s184_s18, %s318_s0 }
   0x7   :  { %p190_p2 = pnand %p188_p1, %p185_p0 }
   0x9   :  { %193 = shalt.err (!%p190_p2)
}
   0xa   :  { %s194_s23 = scalar_lea.vmem %s18_s13, 768  ;;  %p199_p4 = scmp.lt.s32.totalorder %s18_s13, %s18_s13 }
   0xb   :  { %p195_p3 = scmp.ne.s32.totalorder %s18_s13, %s194_s23  ;;  %p200_p5 = scmp.lt.s32.totalorder %s194_s23, %s194_s23 }
   0xd   :  { %p201_p6 = por %p200_p5, %p199_p4 }
   0xf   :  { %p202_p7 = pnand %p201_p6, %p195_p3 }
  0x11   :  { %205 = shalt.err (!%p202_p7)
}
  0x12   :  { %20 = dma.hbm_to_vmem [thread:$0]  %s318_s0, 768, %s18_s13, [#allocation3]  }
  0x13   :  { %s206_s28 = scalar_lea.hbm %s319_s1, 96 }
  0x14   :  { %p207_p8 = scmp.ne.s32.totalorder %s319_s1, %s206_s28  ;;  %p210_p9 = scmp.lt.u32.totalorder %s206_s28, %s319_s1 }
  0x16   :  { %p212_p10 = pnand %p210_p9, %p207_p8 }
  0x18   :  { %215 = shalt.err (!%p212_p10)
}
  0x19   :  { %s216_s6 = scalar_lea.vmem %s28_s15, 96  ;;  %p221_p12 = scmp.lt.s32.totalorder %s28_s15, %s28_s15 }
  0x1a   :  { %p217_p11 = scmp.ne.s32.totalorder %s28_s15, %s216_s6  ;;  %p222_p13 = scmp.lt.s32.totalorder %s216_s6, %s216_s6 }
  0x1c   :  { %p223_p0 = por %p222_p13, %p221_p12 }
  0x1e   :  { %p224_p1 = pnand %p223_p0, %p217_p11 }
  0x20   :  { %227 = shalt.err (!%p224_p1)
}
  0x21   :  { %30 = dma.hbm_to_vmem [thread:$0]  %s319_s1, 96, %s28_s15, [#allocation6]  }
  0x22   :  { %250 = dma.done.wait [#allocation3], 768  }
  0x23   :  { %251 = vsyncadd [#allocation3], 4294966528 }
  0x24   :  { %252 = dma.done.wait [#allocation6], 96  }
  0x25   :  { %253 = vsyncadd [#allocation6], 4294967200  ;;  %v39_v0 = vld [vmem:[#allocation2] sm:$0xff]  ;;  %v40_v1 = vld [vmem:[#allocation2 + $0x8] sm:$0xff]  ;;  %v83_v32 = vlaneseq }
  0x26   :  { %v41_v2 = vld [vmem:[#allocation2 + $0x10] sm:$0xff]  ;;  %v45_v3 = vadd.f32 %v40_v1, %v39_v0  ;;  %v42_v4 = vld [vmem:[#allocation2 + $0x18] sm:$0xff]  ;;  %v43_v6 = vld [vmem:[#allocation2 + $0x20] sm:$0xff] }
  0x27   :  { %v44_v8 = vld [vmem:[#allocation2 + $0x28] sm:$0xff]  ;;  %v84_v34 = vshrl.u32 %v83_v32, 7  ;;  %v81_v37 = vld [vmem:[#allocation5] sm:$0x3f]  ;;  %v119_v42 = vld [vmem:[%s320_s2] sm:$0x3f] }
  0x28   :  { %v46_v5 = vadd.f32 %v45_v3, %v41_v2  ;;  %s258_s2 = smov [#allocation7]  }
  0x29   :  { %v85_v35 = vsub.s32 0, %v84_v34  ;;  %v89_v36 = vsub.s32 1, %v84_v34  ;;  %v93_v38 = vsub.s32 2, %v84_v34  ;;  %v97_v39 = vsub.s32 3, %v84_v34  ;;  %s169_s9 = sshll.u32 %s258_s2, 4  ;;  %s170_s9 = int_to_ptr.vmem [resolvable:$true] %s169_s9 }
  0x2a   :  { %v47_v7 = vadd.f32 %v46_v5, %v42_v4  ;;  %v101_v40 = vsub.s32 4, %v84_v34  ;;  %v105_v41 = vsub.s32 5, %v84_v34  ;;  %s228_s10 = scalar_lea.vmem %s170_s9, 768  ;;  %p233_p3 = scmp.lt.s32.totalorder %s170_s9, %s170_s9 }
  0x2b   :  { %v86_v43 = vrot.slane %v81_v37, %v85_v35  ;;  %v90_v44 = vrot.slane %v81_v37, %v89_v36  ;;  %v94_v45 = vrot.slane %v81_v37, %v93_v38  ;;  %v98_v46 = vrot.slane %v81_v37, %v97_v39  ;;  %p229_p2 = scmp.ne.s32.totalorder %s170_s9, %s228_s10  ;;  %p234_p4 = scmp.lt.s32.totalorder %s228_s10, %s228_s10 }
  0x2c   :  { %v48_v9 = vadd.f32 %v47_v7, %v43_v6  ;;  %v102_v47 = vrot.slane %v81_v37, %v101_v40  ;;  %v106_v48 = vrot.slane %v81_v37, %v105_v41  ;;  %v124_v50 = vrot.slane %v119_v42, %v85_v35 }
  0x2d   :  { %v128_v51 = vrot.slane %v119_v42, %v89_v36  ;;  %v132_v52 = vrot.slane %v119_v42, %v93_v38  ;;  %v136_v53 = vrot.slane %v119_v42, %v97_v39  ;;  %v140_v60 = vrot.slane %v119_v42, %v101_v40  ;;  %p235_p5 = por %p234_p4, %p233_p3 }
  0x2e   :  { %v49_v10 = vadd.f32 %v48_v9, %v44_v8  ;;  %v144_v61 = vrot.slane %v119_v42, %v105_v41 }
  0x2f   :  { %p236_p6 = pnand %p235_p5, %p229_p2 }
  0x30   :  { %50 = vadd.xlane.f32.xlu0 %v49_v10 }
  0xbd   :  { %v51_v11 = vpop.xlane.xlu0 %50 }
  0xbe   :  { %v52_v12 = vmul.f32 0.0013020834, %v51_v11 }
  0xc0   :  { %v53_v13 = vsub.f32 %v39_v0, %v52_v12  ;;  %v54_v14 = vsub.f32 %v40_v1, %v52_v12  ;;  %v55_v15 = vsub.f32 %v41_v2, %v52_v12  ;;  %v56_v16 = vsub.f32 %v42_v4, %v52_v12 }
  0xc1   :  { %v57_v19 = vsub.f32 %v43_v6, %v52_v12  ;;  %v58_v22 = vsub.f32 %v44_v8, %v52_v12 }
  0xc2   :  { %v59_v17 = vmul.f32 %v53_v13, %v53_v13  ;;  %v60_v18 = vmul.f32 %v54_v14, %v54_v14  ;;  %v61_v20 = vmul.f32 %v55_v15, %v55_v15  ;;  %v62_v23 = vmul.f32 %v56_v16, %v56_v16 }
  0xc3   :  { %v63_v25 = vmul.f32 %v57_v19, %v57_v19  ;;  %v64_v27 = vmul.f32 %v58_v22, %v58_v22 }
  0xc4   :  { %v65_v21 = vadd.f32 %v60_v18, %v59_v17 }
  0xc6   :  { %v66_v24 = vadd.f32 %v65_v21, %v61_v20 }
  0xc8   :  { %v67_v26 = vadd.f32 %v66_v24, %v62_v23 }
  0xca   :  { %v68_v28 = vadd.f32 %v67_v26, %v63_v25 }
  0xcc   :  { %v69_v29 = vadd.f32 %v68_v28, %v64_v27 }
  0xce   :  { %70 = vadd.xlane.f32.xlu0 %v69_v29 }
 0x15b   :  { %v71_v30 = vpop.xlane.xlu0 %70 }
 0x15c   :  { %v72_v31 = vmul.f32 0.0013020834, %v71_v30 }
 0x15e   :  { %v73_v33 = vadd.f32 1e-05, %v72_v31 }
 0x160   :  { %182 = vrsqrt.f32 %v73_v33 }
 0x16a   :  { %v183_v49 = vpop.eup %182 }
 0x16b   :  { %v75_v54 = vmul.f32 %v183_v49, %v53_v13  ;;  %v76_v55 = vmul.f32 %v183_v49, %v54_v14  ;;  %v77_v56 = vmul.f32 %v183_v49, %v55_v15  ;;  %v78_v57 = vmul.f32 %v183_v49, %v56_v16 }
 0x16c   :  { %v79_v58 = vmul.f32 %v183_v49, %v57_v19  ;;  %v80_v59 = vmul.f32 %v183_v49, %v58_v22 }
 0x16d   :  { %v113_v62 = vmul.f32 %v86_v43, %v75_v54  ;;  %v114_v63 = vmul.f32 %v90_v44, %v76_v55  ;;  %v115_v0 = vmul.f32 %v94_v45, %v77_v56  ;;  %v116_v1 = vmul.f32 %v98_v46, %v78_v57 }
 0x16e   :  { %v117_v2 = vmul.f32 %v102_v47, %v79_v58  ;;  %v118_v3 = vmul.f32 %v106_v48, %v80_v59 }
 0x16f   :  { %v151_v4 = vadd.f32 %v124_v50, %v113_v62  ;;  %v152_v5 = vadd.f32 %v128_v51, %v114_v63  ;;  %v153_v6 = vadd.f32 %v132_v52, %v115_v0  ;;  %v154_v7 = vadd.f32 %v136_v53, %v116_v1 }
 0x170   :  { %v155_v8 = vadd.f32 %v140_v60, %v117_v2  ;;  %v156_v9 = vadd.f32 %v144_v61, %v118_v3 }
 0x171   :  { %157 = vst [vmem:[#allocation7] sm:$0xff] %v151_v4  ;;  %158 = vst [vmem:[#allocation7 + $0x8] sm:$0xff] %v152_v5 }
 0x172   :  { %159 = vst [vmem:[#allocation7 + $0x10] sm:$0xff] %v153_v6  ;;  %160 = vst [vmem:[#allocation7 + $0x18] sm:$0xff] %v154_v7 }
 0x173   :  { %161 = vst [vmem:[#allocation7 + $0x20] sm:$0xff] %v155_v8  ;;  %162 = vst [vmem:[#allocation7 + $0x28] sm:$0xff] %v156_v9 }
 0x174   :  { %239 = shalt.err (!%p236_p6)
}
 0x175   :  { %s240_s13 = scalar_lea.hbm %s321_s3, 768 }
 0x176   :  { %p241_p7 = scmp.ne.s32.totalorder %s321_s3, %s240_s13  ;;  %p244_p8 = scmp.lt.u32.totalorder %s240_s13, %s321_s3 }
 0x178   :  { %p246_p9 = pnand %p244_p8, %p241_p7 }
 0x17a   :  { %249 = shalt.err (!%p246_p9)
}
 0x17b   :  { %172 = dma.vmem_to_hbm [thread:$0]  %s170_s9, 768, %s321_s3, [#allocation4]  }
 0x17c   :  { %254 = dma.done.wait [#allocation4], 768  }
 0x17d   :  { %255 = vsyncadd [#allocation4], 4294966528 }
 0x17e   :  { %176 = vsyncpa [#allocation3], 1 }
 0x17f   :  { %177 = vsyncpa [#allocation6], 1 }
 0x180   :  { %178 = vsyncpa [#allocation4], 1 }

</bundles_post_ra>
